<compile_context>
chip_gen: v7x
topology: tpu7x:2x2x1
jax: 0.10.0
libtpu: 0.0.40
codegen_flags: <defaults>
</compile_context>

<pallas_src>
import functools
import math

import jax
import jax.numpy as jnp
from jax.experimental import pallas as pl
from jax.experimental.pallas import tpu as pltpu


def _aspp_kernel(xpad_ref, w_ref, scale_ref, shift_ref, o_ref, *, rate, kh_kw):
    # xpad_ref : (1, Hp, Wp, Cin)        zero-padded input image (resident across h-tiles)
    # w_ref    : (KH*KW*Cin, Cout_pad)   im2col-reshaped conv weights (lane-padded)
    # scale_ref: (1, Cout_pad)           folded BN scale  (gamma / sqrt(var + eps), zero-padded)
    # shift_ref: (1, Cout_pad)           folded BN shift  (beta - mean * scale, zero-padded)
    # o_ref    : (1, TH, W, Cout_pad)    output row tile
    KH, KW = kh_kw
    _, TH, W, Cp = o_ref.shape
    Cin = xpad_ref.shape[3]

    h = pl.program_id(1)
    row0 = pl.multiple_of(h * TH, TH)

    # Build the im2col slab (TH*W, KH*KW*Cin): one shifted patch per dilated tap,
    # concatenated along the contraction axis (kh-major, kw, c-minor — matches the
    # (KH, KW, Cin, Cout) -> (KH*KW*Cin, Cout) weight reshape done in the wrapper).
    patches = []
    for kh in range(KH):
        rows = xpad_ref[0, pl.ds(row0 + kh * rate, TH), :, :]        # (TH, Wp, Cin)
        for kw in range(KW):
            patches.append(rows[:, kw * rate:kw * rate + W, :])      # (TH, W, Cin)
    slab = jnp.concatenate(patches, axis=2).reshape(TH * W, KH * KW * Cin)

    # Single MXU contraction, f32 accumulation.
    acc = jnp.dot(slab, w_ref[...], preferred_element_type=jnp.float32)  # (TH*W, Cp)

    # Fused BatchNorm (scale/shift) + ReLU epilogue, then one lane-dense store.
    y = jnp.maximum(acc * scale_ref[...] + shift_ref[...], 0.0)
    o_ref[0] = y.reshape(TH, W, Cp).astype(o_ref.dtype)


def _pick_row_tile(H, W, target_rows=128):
    # Largest divisor of H whose TH*W output-slab row count stays near the MXU's
    # preferred M (~128); also gives the grid >1 h-step so DMA pipelines.
    best = 1
    for th in range(1, H + 1):
        if H % th == 0 and th * W <= max(target_rows, W):
            best = th
    return best


def aspp_forward(x_nchw, w_oihw, bn_gamma, bn_beta, bn_mean, bn_var, *, rate,
                 eps=1e-5, compute_dtype=jnp.float32, row_tile=None):
    """ASPP_module.forward.  x_nchw: (N, Cin, H, W) -> (N, Cout, H, W) float32."""
    N, Cin, H, W = x_nchw.shape
    Cout, Cin_w, KH, KW = w_oihw.shape
    assert Cin_w == Cin, "weight Cin mismatch"
    # Match the module exactly: rate==1 -> 1x1 conv / pad 0, else 3x3 / pad=rate.
    if rate == 1:
        assert KH == 1 and KW == 1, "ASPP_module uses a 1x1 kernel when rate == 1"
    else:
        assert KH == 3 and KW == 3, "ASPP_module uses a 3x3 kernel when rate != 1"
    pad = 0 if rate == 1 else rate

    LANE = 128
    Cp = ((Cout + LANE - 1) // LANE) * LANE            # lane-dense output channels

    # Fold eval-mode BN into a per-channel affine, zero-padded to Cp lanes.
    scale = (bn_gamma / jnp.sqrt(bn_var + eps)).astype(jnp.float32)
    shift = (bn_beta - bn_mean * scale).astype(jnp.float32)
    scale_p = jnp.zeros((1, Cp), jnp.float32).at[0, :Cout].set(scale)
    shift_p = jnp.zeros((1, Cp), jnp.float32).at[0, :Cout].set(shift)

    # NCHW -> NHWC (channels on the lane axis), zero-pad H/W by `pad`.
    x_nhwc = jnp.transpose(x_nchw, (0, 2, 3, 1)).astype(compute_dtype)
    x_pad = jnp.pad(x_nhwc, ((0, 0), (pad, pad), (pad, pad), (0, 0)))
    Hp, Wp = H + 2 * pad, W + 2 * pad

    # (Cout, Cin, KH, KW) -> (KH, KW, Cin, Cout) -> (KH*KW*Cin, Cp) im2col weight.
    w_k = jnp.transpose(w_oihw, (2, 3, 1, 0)).reshape(KH * KW * Cin, Cout)
    w_k = jnp.pad(w_k, ((0, 0), (0, Cp - Cout))).astype(compute_dtype)

    TH = row_tile if row_tile is not None else _pick_row_tile(H, W)
    assert H % TH == 0, "row tile must divide H"
    n_h = H // TH
    K = KH * KW * Cin

    kernel = functools.partial(_aspp_kernel, rate=rate, kh_kw=(KH, KW))

    out = pl.pallas_call(
        kernel,
        out_shape=jax.ShapeDtypeStruct((N, H, W, Cp), jnp.float32),
        grid_spec=pltpu.PrefetchScalarGridSpec(
            num_scalar_prefetch=0,
            grid=(N, n_h),
            in_specs=[
                # Full padded image per batch element; index_map independent of h
                # so the block stays VMEM-resident across the h ("arbitrary") axis.
                pl.BlockSpec((1, Hp, Wp, Cin), lambda n, h: (n, 0, 0, 0)),
                pl.BlockSpec((K, Cp), lambda n, h: (0, 0)),
                pl.BlockSpec((1, Cp), lambda n, h: (0, 0)),
                pl.BlockSpec((1, Cp), lambda n, h: (0, 0)),
            ],
            out_specs=pl.BlockSpec((1, TH, W, Cp), lambda n, h: (n, h, 0, 0)),
        ),
        compiler_params=pltpu.CompilerParams(
            dimension_semantics=("parallel", "arbitrary"),
            vmem_limit_bytes=32 * 1024 * 1024,
        ),
    )(x_pad, w_k, scale_p, shift_p)

    # Drop the zero-padded channels, NHWC -> NCHW to match PyTorch output layout.
    return jnp.transpose(out[..., :Cout], (0, 3, 1, 2))


def _reference(x_nchw, w_oihw, bn_gamma, bn_beta, bn_mean, bn_var, *, rate, eps=1e-5):
    pad = 0 if rate == 1 else rate
    y = jax.lax.conv_general_dilated(
        x_nchw, w_oihw,
        window_strides=(1, 1),
        padding=((pad, pad), (pad, pad)),
        rhs_dilation=(rate, rate),
        dimension_numbers=("NCHW", "OIHW", "NCHW"),
    )
    scale = (bn_gamma / jnp.sqrt(bn_var + eps)).reshape(1, -1, 1, 1)
    shift = (bn_beta - bn_mean * (bn_gamma / jnp.sqrt(bn_var + eps))).reshape(1, -1, 1, 1)
    return jnp.maximum(y * scale + shift, 0.0)


if __name__ == "__main__":
    # Small, deterministic configuration: ASPP_module(inplanes=4, planes=8, rate=2)
    N, Cin, H, W = 2, 4, 16, 16
    Cout, rate = 8, 2
    KH = KW = 3  # rate != 1 -> 3x3 dilated conv

    key = jax.random.PRNGKey(0)
    kx, kw = jax.random.split(key)

    x = jax.random.normal(kx, (N, Cin, H, W), dtype=jnp.float32)

    # kaiming_normal_ (fan_in, gain=sqrt(2)) on the conv weight (Cout, Cin, KH, KW)
    fan_in = Cin * KH * KW
    std = math.sqrt(2.0 / fan_in)
    w = jax.random.normal(kw, (Cout, Cin, KH, KW), dtype=jnp.float32) * std

    # BatchNorm params per _init_weight: gamma=1, beta=0; running stats mean=0, var=1.
    gamma = jnp.ones((Cout,), jnp.float32)
    beta = jnp.zeros((Cout,), jnp.float32)
    mean = jnp.zeros((Cout,), jnp.float32)
    var = jnp.ones((Cout,), jnp.float32)

    ref = _reference(x, w, gamma, beta, mean, var, rate=rate)

    # f32 path (bit-accurate vs the XLA reference conv).
    out = aspp_forward(x, w, gamma, beta, mean, var, rate=rate)
    out = jax.block_until_ready(out)
    assert out.shape == (N, Cout, H, W)
    assert jnp.allclose(out, ref, atol=1e-4, rtol=1e-4), "f32 mismatch vs reference conv"

    # bf16 matmul operands (recommended on v6e/v7x; f32 accumulation + epilogue).
    out_bf16 = aspp_forward(x, w, gamma, beta, mean, var, rate=rate,
                            compute_dtype=jnp.bfloat16)
    out_bf16 = jax.block_until_ready(out_bf16)
    assert jnp.allclose(out_bf16, ref, atol=1e-1, rtol=1e-1), "bf16 mismatch vs reference conv"

    print("KERNEL_OK")
</pallas_src>

<mosaic_0001>
module attributes {stable_mosaic.version = 11 : i64} {
  func.func @_aspp_kernel(%arg0: i32, %arg1: i32, %arg2: memref<1x20x20x4xf32, #tpu.memory_space<vmem>>, %arg3: memref<36x128xf32, #tpu.memory_space<vmem>>, %arg4: memref<1x128xf32, #tpu.memory_space<vmem>>, %arg5: memref<1x128xf32, #tpu.memory_space<vmem>>, %arg6: memref<1x8x16x128xf32, #tpu.memory_space<vmem>>) attributes {dimension_semantics = [#tpu.dimension_semantics<parallel>, #tpu.dimension_semantics<arbitrary>], iteration_bounds = array<i64: 2, 2>, scalar_prefetch = 0 : i64, scratch_operands = 0 : i64, tpu.core_type = #tpu.core_type<tc>, window_params = [{transform_indices = @transform_0, window_bounds = array<i64: 1, 20, 20, 4>}, {pipeline_mode = #tpu.pipeline_mode<synchronous>, transform_indices = @transform_1, window_bounds = array<i64: 36, 128>}, {pipeline_mode = #tpu.pipeline_mode<synchronous>, transform_indices = @transform_2, window_bounds = array<i64: 1, 128>}, {pipeline_mode = #tpu.pipeline_mode<synchronous>, transform_indices = @transform_3, window_bounds = array<i64: 1, 128>}, {transform_indices = @transform_4, window_bounds = array<i64: 1, 8, 16, 128>}]} {
    %c8_i32 = arith.constant 8 : i32
    %0 = arith.muli %arg1, %c8_i32 : i32
    %1 = tpu.assume_multiple %0, 8 : i32
    %c0_i32 = arith.constant 0 : i32
    %2 = arith.addi %1, %c0_i32 : i32
    %c0 = arith.constant 0 : index
    %3 = arith.index_cast %2 : i32 to index
    %c0_0 = arith.constant 0 : index
    %c0_1 = arith.constant 0 : index
    %4 = vector.load %arg2[%c0, %3, %c0_0, %c0_1] : memref<1x20x20x4xf32, #tpu.memory_space<vmem>>, vector<1x8x20x4xf32>
    %5 = vector.shape_cast %4 : vector<1x8x20x4xf32> to vector<8x20x4xf32>
    %6 = vector.extract_strided_slice %5 {offsets = [0, 0, 0], sizes = [8, 16, 4], strides = [1, 1, 1]} : vector<8x20x4xf32> to vector<8x16x4xf32>
    %7 = vector.extract_strided_slice %5 {offsets = [0, 2, 0], sizes = [8, 16, 4], strides = [1, 1, 1]} : vector<8x20x4xf32> to vector<8x16x4xf32>
    %8 = vector.extract_strided_slice %5 {offsets = [0, 4, 0], sizes = [8, 16, 4], strides = [1, 1, 1]} : vector<8x20x4xf32> to vector<8x16x4xf32>
    %c2_i32 = arith.constant 2 : i32
    %9 = arith.addi %1, %c2_i32 : i32
    %c0_2 = arith.constant 0 : index
    %10 = arith.index_cast %9 : i32 to index
    %c0_3 = arith.constant 0 : index
    %c0_4 = arith.constant 0 : index
    %11 = vector.load %arg2[%c0_2, %10, %c0_3, %c0_4] : memref<1x20x20x4xf32, #tpu.memory_space<vmem>>, vector<1x8x20x4xf32>
    %12 = vector.shape_cast %11 : vector<1x8x20x4xf32> to vector<8x20x4xf32>
    %13 = vector.extract_strided_slice %12 {offsets = [0, 0, 0], sizes = [8, 16, 4], strides = [1, 1, 1]} : vector<8x20x4xf32> to vector<8x16x4xf32>
    %14 = vector.extract_strided_slice %12 {offsets = [0, 2, 0], sizes = [8, 16, 4], strides = [1, 1, 1]} : vector<8x20x4xf32> to vector<8x16x4xf32>
    %15 = vector.extract_strided_slice %12 {offsets = [0, 4, 0], sizes = [8, 16, 4], strides = [1, 1, 1]} : vector<8x20x4xf32> to vector<8x16x4xf32>
    %c4_i32 = arith.constant 4 : i32
    %16 = arith.addi %1, %c4_i32 : i32
    %c0_5 = arith.constant 0 : index
    %17 = arith.index_cast %16 : i32 to index
    %c0_6 = arith.constant 0 : index
    %c0_7 = arith.constant 0 : index
    %18 = vector.load %arg2[%c0_5, %17, %c0_6, %c0_7] : memref<1x20x20x4xf32, #tpu.memory_space<vmem>>, vector<1x8x20x4xf32>
    %19 = vector.shape_cast %18 : vector<1x8x20x4xf32> to vector<8x20x4xf32>
    %20 = vector.extract_strided_slice %19 {offsets = [0, 0, 0], sizes = [8, 16, 4], strides = [1, 1, 1]} : vector<8x20x4xf32> to vector<8x16x4xf32>
    %21 = vector.extract_strided_slice %19 {offsets = [0, 2, 0], sizes = [8, 16, 4], strides = [1, 1, 1]} : vector<8x20x4xf32> to vector<8x16x4xf32>
    %22 = vector.extract_strided_slice %19 {offsets = [0, 4, 0], sizes = [8, 16, 4], strides = [1, 1, 1]} : vector<8x20x4xf32> to vector<8x16x4xf32>
    %23 = tpu.concatenate %6, %7, %8, %13, %14, %15, %20, %21, %22 in 2 : vector<8x16x4xf32>, vector<8x16x4xf32>, vector<8x16x4xf32>, vector<8x16x4xf32>, vector<8x16x4xf32>, vector<8x16x4xf32>, vector<8x16x4xf32>, vector<8x16x4xf32>, vector<8x16x4xf32> -> vector<8x16x36xf32>
    %24 = vector.shape_cast %23 : vector<8x16x36xf32> to vector<128x36xf32>
    %c0_8 = arith.constant 0 : index
    %c0_9 = arith.constant 0 : index
    %25 = vector.load %arg3[%c0_8, %c0_9] : memref<36x128xf32, #tpu.memory_space<vmem>>, vector<36x128xf32>
    %cst = arith.constant dense<0.000000e+00> : vector<128x128xf32>
    %26 = tpu.matmul %24, %25, %cst {dimension_numbers = #tpu.dot_dimension_numbers<[1], [0], [0], [1], [0, 0, 1, 1], [], []>} : vector<128x36xf32>, vector<36x128xf32>, vector<128x128xf32> -> vector<128x128xf32>
    %c0_10 = arith.constant 0 : index
    %c0_11 = arith.constant 0 : index
    %27 = vector.load %arg4[%c0_10, %c0_11] : memref<1x128xf32, #tpu.memory_space<vmem>>, vector<1x128xf32>
    %28 = vector.broadcast %27 : vector<1x128xf32> to vector<128x128xf32>
    %29 = arith.mulf %26, %28 : vector<128x128xf32>
    %c0_12 = arith.constant 0 : index
    %c0_13 = arith.constant 0 : index
    %30 = vector.load %arg5[%c0_12, %c0_13] : memref<1x128xf32, #tpu.memory_space<vmem>>, vector<1x128xf32>
    %31 = vector.broadcast %30 : vector<1x128xf32> to vector<128x128xf32>
    %32 = arith.addf %29, %31 : vector<128x128xf32>
    %cst_14 = arith.constant 0.000000e+00 : f32
    %33 = vector.broadcast %cst_14 : f32 to vector<128x128xf32>
    %34 = arith.maximumf %32, %33 : vector<128x128xf32>
    %35 = vector.shape_cast %34 : vector<128x128xf32> to vector<8x16x128xf32>
    %c0_15 = arith.constant 0 : index
    %c0_16 = arith.constant 0 : index
    %c0_17 = arith.constant 0 : index
    %c0_18 = arith.constant 0 : index
    %36 = vector.load %arg6[%c0_15, %c0_16, %c0_17, %c0_18] : memref<1x8x16x128xf32, #tpu.memory_space<vmem>>, vector<1x8x16x128xf32>
    %37 = vector.shape_cast %36 : vector<1x8x16x128xf32> to vector<8x16x128xf32>
    %38 = vector.shape_cast %35 : vector<8x16x128xf32> to vector<1x8x16x128xf32>
    tpu.vector_store %arg6[%c0_15, %c0_16, %c0_17, %c0_18], %38 {strides = array<i32>} : memref<1x8x16x128xf32, #tpu.memory_space<vmem>>, vector<1x8x16x128xf32>,
    return
  }
  func.func @transform_0(%arg0: i32, %arg1: i32) -> (i32, i32, i32, i32) {
    %c0_i32 = arith.constant 0 : i32
    %c0_i32_0 = arith.constant 0 : i32
    %c0_i32_1 = arith.constant 0 : i32
    %c0_i32_2 = arith.constant 0 : i32
    return %arg0, %c0_i32, %c0_i32_0, %c0_i32_1 : i32, i32, i32, i32
  }
  func.func @transform_1(%arg0: i32, %arg1: i32) -> (i32, i32) {
    %c0_i32 = arith.constant 0 : i32
    %c0_i32_0 = arith.constant 0 : i32
    %c0_i32_1 = arith.constant 0 : i32
    return %c0_i32, %c0_i32_0 : i32, i32
  }
  func.func @transform_2(%arg0: i32, %arg1: i32) -> (i32, i32) {
    %c0_i32 = arith.constant 0 : i32
    %c0_i32_0 = arith.constant 0 : i32
    %c0_i32_1 = arith.constant 0 : i32
    return %c0_i32, %c0_i32_0 : i32, i32
  }
  func.func @transform_3(%arg0: i32, %arg1: i32) -> (i32, i32) {
    %c0_i32 = arith.constant 0 : i32
    %c0_i32_0 = arith.constant 0 : i32
    %c0_i32_1 = arith.constant 0 : i32
    return %c0_i32, %c0_i32_0 : i32, i32
  }
  func.func @transform_4(%arg0: i32, %arg1: i32) -> (i32, i32, i32, i32) {
    %c0_i32 = arith.constant 0 : i32
    %c0_i32_0 = arith.constant 0 : i32
    %c0_i32_1 = arith.constant 0 : i32
    return %arg0, %arg1, %c0_i32, %c0_i32_0 : i32, i32, i32, i32
  }
}

</mosaic_0001>

<bundles_post_ra>
// kernel: tpu_custom_call.1
= control target key start
LH: loop header
LB: loop body
LE: loop exit
PB: predicated region body
PF: predicated region fallthrough
CT: control target
= control target key end

     0   :  { %9 = vsyncpa [#allocation3], 0  ;;  %s2950_s0 = inlined_call_operand.vmem [shape: f32[2,20,20,4], index: 0, kind: input, shape index: {}]   ;;  %s2951_s1 = inlined_call_operand.vmem [shape: f32[36,128], index: 1, kind: input, shape index: {}]   ;;  %s2952_s2 = inlined_call_operand.vmem [shape: f32[1,128], index: 2, kind: input, shape index: {}]   ;;  %s2953_s3 = inlined_call_operand.vmem [shape: f32[1,128], index: 3, kind: input, shape index: {}]   ;;  %s2954_s4 = inlined_call_operand.hbm [shape: f32[2,16,16,128], index: 4, kind: output, shape index: {}]  }
   0x1   :  { %11 = vsyncpa [#allocation3 + $0x1], 0  ;;  %s1878_s15 = smov 0   ;;  %s1880_s16 = smov 0  }
   0x2   :  { %s1882_s17 = smov 0   ;;  %s1884_s18 = smov 0  }
   0x3   :  { %s1886_s19 = smov 0   ;;  %s1888_s20 = smov 0  }
   0x4   :  { %s1890_s21 = smov 0   ;;  %s1892_s22 = smov 0  }
   0x5 LB: > { %s1509_s23 = sadd.s32 4294967295, %s1841_s22   ;;  %s1510_s24 = sadd.s32 4294967294, %s1841_s22   ;;  %s1841_s22 = sphi %s1892_s22, %s17_s22   ;;  %s1837_s21 = sphi %s1890_s21, %s3014_s21   ;;  %s1833_s20 = sphi %s1888_s20, %s3013_s20   ;;  %s1829_s19 = sphi %s1886_s19, %s3012_s19   ;;  %s1825_s18 = sphi %s1884_s18, %s3011_s18   ;;  %s1821_s17 = sphi %s1882_s17, %s3010_s17   ;;  %s1817_s16 = sphi %s1880_s16, %s3009_s16   ;;  %s1813_s15 = sphi %s1878_s15, %s3008_s15  }
   0x6   : > { %s26_s25 = sadd.s32 1, %s1833_s20  ;;  %s29_s26 = sadd.s32 1, %s1837_s21 }
   0x7   : > { %p27_p0 = scmp.ge.s32.totalorder %s26_s25, 2  ;;  %p137_p1 = scmp.ne.s32.totalorder %s1821_s17, %s1817_s16 }
   0x8   : > { %p138_p2 = scmp.eq.s32.totalorder %s1509_s23, 3  ;;  %p143_p5 = scmp.ne.s32.totalorder %s1817_s16, %s1813_s15 }
   0x9   : > { %s3016_s25 = smov (%p27_p0, %s26_s25), 0  ;;  %s3018_s26 = smov (!%p27_p0, %s29_s26), %s1837_s21 }
   0xa   : > { %s123_s27 = ssub.s32 %s1833_s20, %s3016_s25  ;;  %p1929_p3 = por %p138_p2, %p137_p1 }
   0xb   : > { %p31_p4 = scmp.ge.s32.totalorder %s3018_s26, 2  ;;  %p144_p6 = scmp.eq.s32.totalorder %s1510_s24, 3 }
   0xc   : > { %p1513_p7 = scmp.ge.s32.totalorder %s1841_s22, 1  ;;  %p179_p9 = scmp.lt.s32.totalorder %s1841_s22, 5 }
   0xd   : > { %s3020_s26 = smov (%p31_p4, %s3018_s26), 0  ;;  %p1938_p8 = por %p144_p6, %p143_p5 }
   0xe   : > { %s122_s30 = ssub.s32 %s1837_s21, %s3020_s26  ;;  %s127_s5 = sadd.s32 1, %s1821_s17 }
   0xf   : > { %s124_s6 = sor.u32 %s123_s27, %s122_s30  ;;  %p180_p10 = pnand %p1513_p7, %p179_p9 }
  0x10   : > { %p125_p11 = scmp.eq.s32.totalorder %s124_s6, 0 }
  0x11   : > { %183 = sbr.rel (%p180_p10) target bundleno = 639 (0x27f), region = 36 }
  0x12   : > { %s1947_s7 = scalar_select %p125_p11, %s1821_s17, %s127_s5  }
  0x18   : > { %p205_p12 = scmp.lt.s32.totalorder %s1829_s19, 1  ;;  %s1517_s9 = smul.u32 192, %s1825_s18  ;;  %vm316_vm0 = vcmask 1045504   ;;  %vm405_vm1 = vcmask 1043456   ;;  %vm990_vm2 = vcmask 31744   ;;  %vm1007_vm3 = vcmask 64512  }
  0x19   : > { %s1843_s23 = smov 4   ;;  %s1844_s24 = smov 8   ;;  %vm1024_vm4 = vcmask 97280   ;;  %vm1041_vm5 = vcmask 130048   ;;  %vm1058_vm6 = vcmask 162816   ;;  %vm1075_vm7 = vcmask 195584  }
  0x1a   : > { %s206_s8 = scalar_select %p205_p12, %s1829_s19, 1  ;;  %vm1092_vm8 = vcmask 228352   ;;  %vm1109_vm9 = vcmask 261120   ;;  %vm1131_vm10 = vcmask 293888  }
  0x1b   : > { %s1845_s27 = smov 12   ;;  %s1846_s30 = smov 16  }
  0x1c   : > { %s1666_s10 = smul.u32 480, %s206_s8  ;;  %s1847_s5 = smov 20  }
  0x1d   : > { %s1848_s6 = smov 24   ;;  %s1849_s8 = smov 28  }
  0x1e   : > { %s209_s13 = scalar_lea.vmem %s2950_s0, %s1666_s10  ;;  %s1850_s12 = smov 32  }
  0x1f   : > { %s1955_s14 = scalar_lea.vmem %s209_s13, %s1517_s9  ;;  %s1596_s10 = sshll.u32 %s1825_s18, 4 }
  0x20   : > { %v1958_v0 = vld [vmem:[%s1955_s14 + $0x8] sm:$0xff]  ;;  %v216_v1 = vld [vmem:[%s1955_s14 + $0x10] sm:$0xf]  ;;  %v1962_v2 = vld [vmem:[%s1955_s14] sm:$0xff]  ;;  %s1592_s11 = sshll.u32 %s1829_s19, 5 }
  0x21   : > { %v318_v3 = vrot.slane %v1958_v0, 2  ;;  %v320_v4 = vrot.slane %v216_v1, 2  ;;  %v317_v5 = vrot.slane %v1962_v2, 2  ;;  %v1967_v6 = vld [vmem:[%s1955_s14 + $0x68] sm:$0xff]  ;;  %v228_v7 = vld [vmem:[%s1955_s14 + $0x70] sm:$0xf] }
  0x22   : > { %v1971_v8 = vrot.slane %v1967_v6, 2  ;;  %v340_v9 = vrot.slane %v228_v7, 2  ;;  %v1974_v10 = vld [vmem:[%s1955_s14 + $0x60] sm:$0xff]  ;;  %v1982_v14 = vrot.slane %v1967_v6, 4  ;;  %v406_v15 = vrot.slane %v1962_v2, 4  ;;  %v2010_v26 = vld [vmem:[%s1955_s14 + $0x90] sm:$0xff] }
  0x23   : > { %v321_v11 = vsel %vm316_vm0, %v318_v3, %v320_v4  ;;  %v319_v12 = vsel %vm316_vm0, %v317_v5, %v318_v3  ;;  %v337_v13 = vrot.slane %v1974_v10, 2  ;;  %v426_v18 = vrot.slane %v1974_v10, 4  ;;  %v2013_v27 = vld [vmem:[%s1955_s14 + $0x30] sm:$0xff]  ;;  %v2016_v28 = vld [vmem:[%s1955_s14 + $0x98] sm:$0xff]  ;;  %v2037_v35 = vld [vmem:[%s1955_s14 + $0x80] sm:$0xff] }
  0x24   : > { %359 = vrot.lane.b32.xlu1 %v321_v11, %s1843_s23  ;;  %357 = vrot.lane.b32.xlu0 %v319_v12, %s1843_s23  ;;  %v341_v16 = vsel %vm316_vm0, %v1971_v8, %v340_v9  ;;  %v407_v19 = vrot.slane %v1958_v0, 4  ;;  %v429_v22 = vrot.slane %v228_v7, 4  ;;  %v409_v23 = vrot.slane %v216_v1, 4  ;;  %2974 = vst [vmem:[#allocation5_spill] sm:$0xff] %v2013_v27  ;;  %v2019_v29 = vld [vmem:[%s1955_s14 + $0x38] sm:$0xff]  ;;  %v2043_v37 = vld [vmem:[%s1955_s14 + $0x20] sm:$0xff] }
  0x25   : > { %v1989_v17 = vsel %vm316_vm0, %v337_v13, %v1971_v8  ;;  %v1998_v20 = vsel %vm405_vm1, %v426_v18, %v1982_v14  ;;  %2975 = vst [vmem:[#allocation6_spill] sm:$0xff] %v2019_v29  ;;  %v586_v30 = vrot.slane %v2010_v26, 2  ;;  %v566_v31 = vrot.slane %v2013_v27, 2  ;;  %v2034_v34 = vld [vmem:[%s1955_s14 + $0x78] sm:$0xff]  ;;  %v1534_v44 = vld [vmem:[%s1955_s14 + $0xa0] sm:$0xf] }
  0x26   : > { %v408_v21 = vsel %vm405_vm1, %v406_v15, %v407_v19  ;;  %v430_v24 = vsel %vm405_vm1, %v1982_v14, %v429_v22  ;;  %v410_v25 = vsel %vm405_vm1, %v407_v19, %v409_v23  ;;  %v2028_v32 = vrot.slane %v2016_v28, 2  ;;  %v2040_v36 = vld [vmem:[%s1955_s14 + $0x18] sm:$0xff]  ;;  %v1522_v45 = vld [vmem:[%s1955_s14 + $0x40] sm:$0xf]  ;;  %v231_v56 = vld [vmem:[%s1955_s14 + $0x88] sm:$0xf] }
  0x27   : > { %v2031_v33 = vrot.slane %v2019_v29, 2  ;;  %v342_v38 = vrot.slane %v2034_v34, 2  ;;  %v2051_v39 = vrot.slane %v2037_v35, 2  ;;  %v322_v42 = vrot.slane %v2040_v36, 2  ;;  %v219_v57 = vld [vmem:[%s1955_s14 + $0x28] sm:$0xf] }
  0x28   : > { %375 = vrot.lane.b32.xlu1 %v341_v16, %s1843_s23  ;;  %373 = vrot.lane.b32.xlu0 %v1989_v17, %s1843_s23  ;;  %v2055_v40 = vsel %vm316_vm0, %v586_v30, %v2028_v32  ;;  %v323_v43 = vrot.slane %v2043_v37, 2  ;;  %v589_v48 = vrot.slane %v1534_v44, 2  ;;  %v569_v49 = vrot.slane %v1522_v45, 2  ;;  %v2131_v16 = vld [vmem:[%s1955_s14 + $0xc0] sm:$0xff]  ;;  %v2143_v23 = vld [vmem:[%s1955_s14 + $0xa8] sm:$0xff] }
  0x29   : > { %2976 = vst [vmem:[#allocation7_spill] sm:$0xff] %v2051_v39  ;;  %v2059_v41 = vsel %vm316_vm0, %v566_v31, %v2031_v33  ;;  %v2071_v46 = vsel %vm316_vm0, %v342_v38, %v2051_v39  ;;  %v674_v50 = vrot.slane %v2010_v26, 4  ;;  %v654_v51 = vrot.slane %v2013_v27, 4  ;;  %2980 = vst [vmem:[#allocation11_spill] sm:$0xff] %v2143_v23 }
  0x2a   : > { %v324_v47 = vsel %vm316_vm0, %v322_v42, %v323_v43  ;;  %v2080_v52 = vrot.slane %v2016_v28, 4  ;;  %v2083_v53 = vrot.slane %v2019_v29, 4  ;;  %v590_v54 = vsel %vm316_vm0, %v2028_v32, %v589_v48  ;;  %v2168_v42 = vld [vmem:[%s1955_s14 + $0xb0] sm:$0xff] }
  0x2b   : > { %v570_v55 = vsel %vm316_vm0, %v2031_v33, %v569_v49  ;;  %v345_v60 = vrot.slane %v231_v56, 2  ;;  %v325_v61 = vrot.slane %v219_v57, 2  ;;  %v431_v62 = vrot.slane %v2034_v34, 4  ;;  %2982 = vst [vmem:[#allocation13_spill] sm:$0xff] %v2168_v42  ;;  %v2186_v49 = vld [vmem:[%s1955_s14 + $0xd0] sm:$0xf] }
  0x2c   : > { %462 = vrot.lane.b32.xlu1 %v1998_v20, %s1844_s24  ;;  %446 = vrot.lane.b32.xlu0 %v408_v21, %s1844_s24  ;;  %2977 = vst [vmem:[#allocation8_spill] sm:$0xff] %v2080_v52  ;;  %v2095_v58 = vsel %vm405_vm1, %v674_v50, %v2080_v52  ;;  %v2099_v59 = vsel %vm405_vm1, %v654_v51, %v2083_v53  ;;  %v2107_v63 = vrot.slane %v2037_v35, 4  ;;  %v411_v4 = vrot.slane %v2040_v36, 4  ;;  %v2189_v50 = vld [vmem:[%s1955_s14 + $0x70] sm:$0xf] }
  0x2d   : > { %2978 = vst [vmem:[#allocation9_spill] sm:$0xff] %v2095_v58  ;;  %v346_v1 = vsel %vm316_vm0, %v2051_v39, %v345_v60  ;;  %v326_v3 = vsel %vm316_vm0, %v323_v43, %v325_v61  ;;  %v412_v5 = vrot.slane %v2043_v37, 4  ;;  %v677_v11 = vrot.slane %v1534_v44, 4  ;;  %v2171_v43 = vld [vmem:[%s1955_s14 + $0x50] sm:$0xff]  ;;  %v1126_v60 = vld [vmem:[%s2951_s1] sm:$0xff]  ;;  %v1127_v61 = vld [vmem:[%s2951_s1 + $0x8] sm:$0xff] }
  0x2e   : > { %v2118_v7 = vsel %vm405_vm1, %v431_v62, %v2107_v63  ;;  %v657_v12 = vrot.slane %v1522_v45, 4  ;;  %v434_v18 = vrot.slane %v231_v56, 4  ;;  %v414_v19 = vrot.slane %v219_v57, 4  ;;  %2983 = vst [vmem:[#allocation14_spill] sm:$0xff] %v2171_v43 }
  0x2f   : > { %2979 = vst [vmem:[#allocation10_spill] sm:$0xff] %v2118_v7  ;;  %v413_v9 = vsel %vm405_vm1, %v411_v4, %v412_v5  ;;  %v678_v13 = vsel %vm405_vm1, %v2080_v52, %v677_v11  ;;  %v834_v30 = vrot.slane %v2131_v16, 2  ;;  %v591_v44 = vrot.slane %v2143_v23, 2 }
  0x30   : > { %464 = vrot.lane.b32.xlu1 %v430_v24, %s1844_s24  ;;  %448 = vrot.lane.b32.xlu0 %v410_v25, %s1844_s24  ;;  %v658_v15 = vsel %vm405_vm1, %v2083_v53, %v657_v12  ;;  %v435_v21 = vsel %vm405_vm1, %v2107_v63, %v434_v18  ;;  %v415_v22 = vsel %vm405_vm1, %v412_v5, %v414_v19  ;;  %v2146_v24 = vld [vmem:[%s1955_s14 + $0x48] sm:$0xff]  ;;  %v2183_v48 = vrot.slane %v2171_v43, 2  ;;  %v1128_v5 = vld [vmem:[%s2951_s1 + $0x10] sm:$0xff] }
  0x31   : > { %2981 = vst [vmem:[#allocation12_spill] sm:$0xff] %v2146_v24  ;;  %v2149_v25 = vld [vmem:[%s1955_s14 + $0xc8] sm:$0xff]  ;;  %v571_v45 = vrot.slane %v2146_v24, 2  ;;  %v817_v56 = vrot.slane %v2189_v50, 2  ;;  %v922_v57 = vrot.slane %v2131_v16, 4  ;;  %v1652_v4 = vpack.c.bf16 %v1127_v61, %v1126_v60 }
  0x32   : > { %v2157_v31 = vrot.slane %v2149_v25, 2  ;;  %v2217_v62 = vrot.slane %v2149_v25, 4  ;;  %v925_v60 = vrot.slane %v2186_v49, 4  ;;  %v905_v61 = vrot.slane %v2189_v50, 4 }
  0x33   : > { %1653 = vmatprep.subr.bf16.mxu0 %v1652_v4  ;;  %1660 = vmatprep.subr.bf16.mxu1 %v1652_v4 }
  0x34   : > { %526 = vrot.lane.b32.xlu1 %v2010_v26, %s1845_s27  ;;  %510 = vrot.lane.b32.xlu0 %v2013_v27, %s1845_s27  ;;  %v2165_v38 = vsel %vm316_vm0, %v834_v30, %v2157_v31  ;;  %v2233_v11 = vsel %vm405_vm1, %v922_v57, %v2217_v62  ;;  %v659_v30 = vrot.slane %v2146_v24, 4 }
  0x35   : > { %1655 = vmatpush3.bf16.msra.mxu0 %v1652_v4  ;;  %1663 = vmatpush3.bf16.msra.mxu1 %v1652_v4  ;;  %v926_v4 = vsel %vm405_vm1, %v2217_v62, %v925_v60 }
  0x38   : > { %528 = vrot.lane.b32.xlu1 %v2016_v28, %s1845_s27  ;;  %512 = vrot.lane.b32.xlu0 %v2019_v29, %s1845_s27 }
  0x3c   : > { %622 = vrot.lane.b32.xlu1 %v2055_v40, %s1846_s30  ;;  %606 = vrot.lane.b32.xlu0 %v2059_v41, %s1846_s30 }
  0x40   : > { %377 = vrot.lane.b32.xlu1 %v2071_v46, %s1843_s23  ;;  %361 = vrot.lane.b32.xlu0 %v324_v47, %s1843_s23  ;;  %v2180_v47 = vrot.slane %v2168_v42, 2 }
  0x42   : > { %v2197_v51 = vsel %vm316_vm0, %v591_v44, %v2180_v47  ;;  %v2253_v44 = vrot.slane %v2168_v42, 4 }
  0x43   : > { %2984 = vst [vmem:[#allocation15_spill] sm:$0xff] %v2197_v51 }
  0x44   : > { %624 = vrot.lane.b32.xlu1 %v590_v54, %s1846_s30  ;;  %608 = vrot.lane.b32.xlu0 %v570_v55, %s1846_s30  ;;  %v2201_v54 = vsel %vm316_vm0, %v571_v45, %v2183_v48  ;;  %v837_v55 = vrot.slane %v2186_v49, 2  ;;  %2985 = vst [vmem:[#allocation16_spill] sm:$0xff] %v2253_v44  ;;  %v2256_v45 = vrot.slane %v2171_v43, 4 }
  0x46   : > { %v2272_v57 = vsel %vm405_vm1, %v659_v30, %v2256_v45 }
  0x48   : > { %710 = vrot.lane.b32.xlu1 %v2095_v58, %s1847_s5  ;;  %694 = vrot.lane.b32.xlu0 %v2099_v59, %s1847_s5 }
  0x4c   : > { %379 = vrot.lane.b32.xlu1 %v346_v1, %s1843_s23  ;;  %363 = vrot.lane.b32.xlu0 %v326_v3, %s1843_s23  ;;  %v838_v1 = vsel %vm316_vm0, %v2157_v31, %v837_v55  ;;  %v818_v3 = vsel %vm316_vm0, %v1971_v8, %v817_v56 }
  0x50   : > { %466 = vrot.lane.b32.xlu1 %v2118_v7, %s1844_s24  ;;  %450 = vrot.lane.b32.xlu0 %v413_v9, %s1844_s24  ;;  %v1129_v9 = vld [vmem:[%s2951_s1 + $0x18] sm:$0xff] }
  0x51   : > { %v1656_v12 = vpack.c.bf16 %v1129_v9, %v1128_v5  ;;  %v906_v5 = vsel %vm405_vm1, %v1982_v14, %v905_v61 }
  0x53   : > { %1657 = vmatprep.subr.bf16.mxu0 %v1656_v12  ;;  %1661 = vmatprep.subr.bf16.mxu1 %v1656_v12 }
  0x54   : > { %712 = vrot.lane.b32.xlu1 %v678_v13, %s1847_s5  ;;  %696 = vrot.lane.b32.xlu0 %v658_v15, %s1847_s5  ;;  %v1537_v13 = vld [vmem:[%s1955_s14 + $0xb8] sm:$0xf] }
  0x55   : > { %v1525_v15 = vld [vmem:[%s1955_s14 + $0x58] sm:$0xf]  ;;  %v594_v18 = vrot.slane %v1537_v13, 2  ;;  %1659 = vmatpush3.bf16.msra.mxu0 %v1656_v12  ;;  %1664 = vmatpush3.bf16.msra.mxu1 %v1656_v12 }
  0x56   : > { %v574_v19 = vrot.slane %v1525_v15, 2 }
  0x57   : > { %v595_v55 = vsel %vm316_vm0, %v2180_v47, %v594_v18  ;;  %v682_v18 = vrot.slane %v1537_v13, 4 }
  0x58   : > { %774 = vrot.lane.b32.xlu1 %v2131_v16, %s1848_s6  ;;  %758 = vrot.lane.b32.xlu0 %v1974_v10, %s1848_s6  ;;  %v575_v56 = vsel %vm316_vm0, %v2183_v48, %v574_v19  ;;  %v662_v19 = vrot.slane %v1525_v15, 4 }
  0x5c   : > { %468 = vrot.lane.b32.xlu1 %v435_v21, %s1844_s24  ;;  %452 = vrot.lane.b32.xlu0 %v415_v22, %s1844_s24  ;;  %v1130_v21 = vld [vmem:[%s2951_s1 + $0x20] sm:$0xf]  ;;  %v679_v22 = vrot.slane %v2143_v23, 4 }
  0x5d   : > { %1626 = vmatprep.subr.msk.mxu0 %vm405_vm1, %v1130_v21  ;;  %1662 = vmatprep.subr.msk.mxu1 %vm405_vm1, %v1130_v21 }
  0x5e   : > { %1627 = vmatpush3.msk.msra.mxu0 %vm405_vm1, %v1130_v21  ;;  %1665 = vmatpush3.msk.msra.mxu1 %vm405_vm1, %v1130_v21  ;;  %v683_v21 = vsel %vm405_vm1, %v2253_v44, %v682_v18 }
  0x60   : > { %530 = vrot.lane.b32.xlu1 %v2143_v23, %s1845_s27  ;;  %514 = vrot.lane.b32.xlu0 %v2146_v24, %s1845_s27 }
  0x64   : > { %776 = vrot.lane.b32.xlu1 %v2149_v25, %s1848_s6  ;;  %760 = vrot.lane.b32.xlu0 %v1967_v6, %s1848_s6 }
  0x68   : > { %870 = vrot.lane.b32.xlu1 %v2165_v38, %s1849_s8  ;;  %854 = vrot.lane.b32.xlu0 %v1989_v17, %s1849_s8 }
  0x6c   : > { %532 = vrot.lane.b32.xlu1 %v2168_v42, %s1845_s27  ;;  %516 = vrot.lane.b32.xlu0 %v2171_v43, %s1845_s27 }
  0x70   : > { %626 = vrot.lane.b32.xlu1 %v2197_v51, %s1846_s30  ;;  %610 = vrot.lane.b32.xlu0 %v2201_v54, %s1846_s30 }
  0x74   : > { %872 = vrot.lane.b32.xlu1 %v838_v1, %s1849_s8  ;;  %856 = vrot.lane.b32.xlu0 %v818_v3, %s1849_s8  ;;  %v234_v1 = vld [vmem:[%s1955_s14 + $0xa0] sm:$0xf] }
  0x75   : > { %v222_v3 = vld [vmem:[%s1955_s14 + $0x40] sm:$0xf]  ;;  %v350_v9 = vrot.slane %v234_v1, 2  ;;  %v439_v13 = vrot.slane %v234_v1, 4 }
  0x76   : > { %v330_v12 = vrot.slane %v222_v3, 2  ;;  %v419_v15 = vrot.slane %v222_v3, 4 }
  0x77   : > { %v351_v49 = vsel %vm316_vm0, %v2028_v32, %v350_v9 }
  0x78   : > { %958 = vrot.lane.b32.xlu1 %v2233_v11, %s1850_s12  ;;  %942 = vrot.lane.b32.xlu0 %v1998_v20, %s1850_s12  ;;  %v331_v50 = vsel %vm316_vm0, %v2031_v33, %v330_v12  ;;  %v2305_v33 = vld [vmem:[%s1955_s14 + $0xd8] sm:$0xff] }
  0x7c   : > { %381 = vrot.lane.b32.xlu1 %v2055_v40, %s1843_s23  ;;  %365 = vrot.lane.b32.xlu0 %v2059_v41, %s1843_s23  ;;  %v2268_v41 = vsel %vm405_vm1, %v679_v22, %v2253_v44  ;;  %v663_v22 = vsel %vm405_vm1, %v2256_v45, %v662_v19 }
  0x7d   : > { %2986 = vst [vmem:[#allocation17_spill] sm:$0xff] %v2268_v41 }
  0x80   : > { %628 = vrot.lane.b32.xlu1 %v595_v55, %s1846_s30  ;;  %612 = vrot.lane.b32.xlu0 %v575_v56, %s1846_s30  ;;  %v420_v56 = vsel %vm405_vm1, %v2083_v53, %v419_v15  ;;  %v839_v53 = vrot.slane %v2305_v33, 2 }
  0x84   : > { %714 = vrot.lane.b32.xlu1 %v2268_v41, %s1847_s5  ;;  %698 = vrot.lane.b32.xlu0 %v2272_v57, %s1847_s5 }
  0x88   : > { %960 = vrot.lane.b32.xlu1 %v926_v4, %s1850_s12  ;;  %944 = vrot.lane.b32.xlu0 %v906_v5, %s1850_s12  ;;  %v2330_v4 = vld [vmem:[%s1955_s14 + $0xe0] sm:$0xff] }
  0x89   : > { %v2338_v5 = vrot.slane %v2330_v4, 2 }
  0x8b   : > { %2987 = vst [vmem:[#allocation18_spill] sm:$0xff] %v2338_v5 }
  0x8c   : > { %383 = vrot.lane.b32.xlu1 %v351_v49, %s1843_s23  ;;  %367 = vrot.lane.b32.xlu0 %v331_v50, %s1843_s23 }
  0x90   : > { %470 = vrot.lane.b32.xlu1 %v2095_v58, %s1844_s24  ;;  %454 = vrot.lane.b32.xlu0 %v2099_v59, %s1844_s24  ;;  %v440_v59 = vsel %vm405_vm1, %v2080_v52, %v439_v13  ;;  %v1528_v52 = vld [vmem:[%s1955_s14 + $0x70] sm:$0xf] }
  0x94   : > { %716 = vrot.lane.b32.xlu1 %v683_v21, %s1847_s5  ;;  %700 = vrot.lane.b32.xlu0 %v663_v22, %s1847_s5  ;;  %v1563_v21 = vld [vmem:[%s1955_s14 + $0xe8] sm:$0xf] }
  0x95   : > { %v1551_v22 = vld [vmem:[%s1955_s14 + $0x88] sm:$0xf]  ;;  %v842_v13 = vrot.slane %v1563_v21, 2 }
  0x96   : > { %v2307_v30 = vpop.permute.xlu1 %359  ;;  %v2309_v55 = vpop.permute.xlu0 %357  ;;  %v822_v15 = vrot.slane %v1551_v22, 2  ;;  %v910_v58 = vrot.slane %v1551_v22, 4 }
  0x97   : > { %v843_v43 = vsel %vm316_vm0, %v2338_v5, %v842_v13  ;;  %v1540_v13 = vld [vmem:[%s1955_s14 + $0xd0] sm:$0xf] }
  0x98   : > { %778 = vrot.lane.b32.xlu1 %v2305_v33, %s1848_s6  ;;  %762 = vrot.lane.b32.xlu0 %v2034_v34, %s1848_s6  ;;  %v823_v24 = vsel %vm316_vm0, %v2051_v39, %v822_v15  ;;  %v599_v15 = vrot.slane %v1540_v13, 2 }
  0x9a   : > { %v2319_v60 = vpop.permute.xlu1 %375  ;;  %v2321_v61 = vpop.permute.xlu0 %373  ;;  %v600_v27 = vsel %vm316_vm0, %v2157_v31, %v599_v15  ;;  %v687_v15 = vrot.slane %v1540_v13, 4 }
  0x9c   : > { %472 = vrot.lane.b32.xlu1 %v440_v59, %s1844_s24  ;;  %456 = vrot.lane.b32.xlu0 %v420_v56, %s1844_s24 }
  0x9e   : > { %v2325_v1 = vpop.permute.xlu1 %462  ;;  %v2327_v3 = vpop.permute.xlu0 %446 }
  0xa0   : > { %534 = vrot.lane.b32.xlu1 %v2131_v16, %s1845_s27  ;;  %518 = vrot.lane.b32.xlu0 %v1974_v10, %s1845_s27  ;;  %v2350_v16 = vsel %vm316_vm0, %v839_v53, %v2338_v5  ;;  %v927_v53 = vrot.slane %v2305_v33, 4  ;;  %v930_v5 = vrot.slane %v1563_v21, 4 }
  0xa2   : > { %v2340_v9 = vpop.permute.xlu1 %464  ;;  %v2342_v12 = vpop.permute.xlu0 %448 }
  0xa4   : > { %780 = vrot.lane.b32.xlu1 %v2330_v4, %s1848_s6  ;;  %764 = vrot.lane.b32.xlu0 %v2037_v35, %s1848_s6 }
  0xa6   : > { %v2352_v49 = vpop.permute.xlu1 %526  ;;  %v2354_v50 = vpop.permute.xlu0 %510 }
  0xa8   : > { %874 = vrot.lane.b32.xlu1 %v2350_v16, %s1849_s8  ;;  %858 = vrot.lane.b32.xlu0 %v2071_v46, %s1849_s8 }
  0xaa   : > { %v2360_v18 = vpop.permute.xlu1 %528  ;;  %v2362_v19 = vpop.permute.xlu0 %512 }
  0xac   : > { %536 = vrot.lane.b32.xlu1 %v2149_v25, %s1845_s27  ;;  %520 = vrot.lane.b32.xlu0 %v1967_v6, %s1845_s27  ;;  %v2380_v25 = vrot.slane %v2330_v4, 4 }
  0xae   : > { %v2370_v59 = vpop.permute.xlu1 %622  ;;  %v2372_v56 = vpop.permute.xlu0 %606 }
  0xb0   : > { %630 = vrot.lane.b32.xlu1 %v2165_v38, %s1846_s30  ;;  %614 = vrot.lane.b32.xlu0 %v1989_v17, %s1846_s30  ;;  %v2394_v17 = vsel %vm405_vm1, %v927_v53, %v2380_v25 }
  0xb1   : > { %2988 = vst [vmem:[#allocation19_spill] sm:$0xff] %v2394_v17 }
  0xb2   : > { %v2386_v42 = vpop.permute.xlu1 %377  ;;  %v2388_v29 = vpop.permute.xlu0 %361 }
  0xb4   : > { %876 = vrot.lane.b32.xlu1 %v843_v43, %s1849_s8  ;;  %860 = vrot.lane.b32.xlu0 %v823_v24, %s1849_s8  ;;  %v579_v43 = vrot.slane %v1528_v52, 2 }
  0xb6   : > { %v2396_v38 = vpop.permute.xlu1 %624  ;;  %v2398_v23 = vpop.permute.xlu0 %608 }
  0xb7   : > { %2989 = vst [vmem:[#allocation20_spill] sm:$0xff] %v2396_v38  ;;  %2990 = vst [vmem:[#allocation21_spill] sm:$0xff] %v2398_v23  ;;  %v237_v38 = vld [vmem:[%s1955_s14 + $0xb8] sm:$0xf] }
  0xb8   : > { %962 = vrot.lane.b32.xlu1 %v2394_v17, %s1850_s12  ;;  %946 = vrot.lane.b32.xlu0 %v2118_v7, %s1850_s12  ;;  %v580_v7 = vsel %vm316_vm0, %v1971_v8, %v579_v43  ;;  %v931_v8 = vsel %vm405_vm1, %v2380_v25, %v930_v5  ;;  %v355_v31 = vrot.slane %v237_v38, 2  ;;  %v667_v43 = vrot.slane %v1528_v52, 4  ;;  %v2465_v52 = vld [vmem:[%s1955_s14 + $0xf0] sm:$0xff] }
  0xb9   : > { %v444_v13 = vrot.slane %v237_v38, 4 }
  0xba   : > { %v2406_v24 = vpop.permute.xlu1 %710  ;;  %v2408_v53 = vpop.permute.xlu0 %694 }
  0xbc   : > { %385 = vrot.lane.b32.xlu1 %v2197_v51, %s1843_s23  ;;  %369 = vrot.lane.b32.xlu0 %v2201_v54, %s1843_s23  ;;  %v225_v54 = vld [vmem:[%s1955_s14 + $0x58] sm:$0xf] }
  0xbe   : > { %v2418_v17 = vpop.permute.xlu1 %379  ;;  %v2420_v39 = vpop.permute.xlu0 %363 }
  0xc0   : > { %632 = vrot.lane.b32.xlu1 %v600_v27, %s1846_s30  ;;  %616 = vrot.lane.b32.xlu0 %v580_v7, %s1846_s30  ;;  %v911_v27 = vsel %vm405_vm1, %v2107_v63, %v910_v58  ;;  %v335_v7 = vrot.slane %v225_v54, 2 }
  0xc2   : > { %v467_v51 = vpop.permute.xlu1 %466  ;;  %v451_v23 = vpop.permute.xlu0 %450 }
  0xc4   : > { %718 = vrot.lane.b32.xlu1 %v2233_v11, %s1847_s5  ;;  %702 = vrot.lane.b32.xlu0 %v1998_v20, %s1847_s5  ;;  %v356_v11 = vsel %vm316_vm0, %v2180_v47, %v355_v31  ;;  %v336_v20 = vsel %vm316_vm0, %v2183_v48, %v335_v7  ;;  %v688_v48 = vsel %vm405_vm1, %v2217_v62, %v687_v15 }
  0xc5   : > { %v668_v31 = vsel %vm405_vm1, %v1982_v14, %v667_v43  ;;  %v445_v14 = vsel %vm405_vm1, %v2253_v44, %v444_v13 }
  0xc6   : > { %v2434_v21 = vpop.permute.xlu1 %712  ;;  %v2436_v22 = vpop.permute.xlu0 %696 }
  0xc8   : > { %964 = vrot.lane.b32.xlu1 %v931_v8, %s1850_s12  ;;  %948 = vrot.lane.b32.xlu0 %v911_v27, %s1850_s12 }
  0xca   : > { %v2444_v5 = vpop.permute.xlu1 %774  ;;  %v2446_v58 = vpop.permute.xlu0 %758 }
  0xcc   : > { %387 = vrot.lane.b32.xlu1 %v356_v11, %s1843_s23  ;;  %371 = vrot.lane.b32.xlu0 %v336_v20, %s1843_s23  ;;  %v424_v20 = vrot.slane %v225_v54, 4 }
  0xce   : > { %v2450_v8 = vpop.permute.xlu1 %468  ;;  %v2452_v27 = vpop.permute.xlu0 %452  ;;  %v425_v62 = vsel %vm405_vm1, %v2256_v45, %v424_v20  ;;  %v993_v45 = vsel %vm990_vm2, %v2040_v36, %v2388_v29 }
  0xcf   : > { %v1010_v20 = vsel %vm1007_vm3, %v993_v45, %v451_v23  ;;  %v991_v23 = vsel %vm990_vm2, %v1962_v2, %v2309_v55 }
  0xd0   : > { %474 = vrot.lane.b32.xlu1 %v2268_v41, %s1844_s24  ;;  %458 = vrot.lane.b32.xlu0 %v2272_v57, %s1844_s24 }
  0xd2   : > { %v531_v7 = vpop.permute.xlu1 %530  ;;  %v515_v11 = vpop.permute.xlu0 %514 }
  0xd3   : > { %v1027_v44 = vsel %vm1024_vm4, %v1010_v20, %v515_v11 }
  0xd4   : > { %720 = vrot.lane.b32.xlu1 %v688_v48, %s1847_s5  ;;  %704 = vrot.lane.b32.xlu0 %v668_v31, %s1847_s5  ;;  %v2486_v48 = vld [vmem:[%s1955_s14 + $0xf8] sm:$0xff]  ;;  %v1001_v31 = vsel %vm990_vm2, %v2034_v34, %v2386_v42 }
  0xd5   : > { %v1018_v13 = vsel %vm1007_vm3, %v1001_v31, %v467_v51  ;;  %v999_v51 = vsel %vm990_vm2, %v1974_v10, %v2321_v61 }
  0xd6   : > { %v2467_v41 = vpop.permute.xlu1 %776  ;;  %v2469_v57 = vpop.permute.xlu0 %760  ;;  %v1035_v42 = vsel %vm1024_vm4, %v1018_v13, %v531_v7  ;;  %v1016_v7 = vsel %vm1007_vm3, %v999_v51, %v2325_v1  ;;  %v933_v51 = vrot.slane %v2486_v48, 4 }
  0xd7   : > { %v1033_v2 = vsel %vm1024_vm4, %v1016_v7, %v2352_v49 }
  0xd8   : > { %782 = vrot.lane.b32.xlu1 %v2465_v52, %s1848_s6  ;;  %766 = vrot.lane.b32.xlu0 %v2010_v26, %s1848_s6  ;;  %v1050_v1 = vsel %vm1041_vm5, %v1033_v2, %v2370_v59 }
  0xd9   : > { %v1067_v49 = vsel %vm1058_vm6, %v1050_v1, %v2406_v24 }
  0xda   : > { %v871_v15 = vpop.permute.xlu1 %870  ;;  %v855_v43 = vpop.permute.xlu0 %854  ;;  %v1084_v59 = vsel %vm1075_vm7, %v1067_v49, %v2444_v5  ;;  %v2993_v49 = vld [vmem:[#allocation9_spill] sm:$0xff] }
  0xdb   : > { %v1101_v31 = vsel %vm1092_vm8, %v1084_v59, %v871_v15 }
  0xdc   : > { %476 = vrot.lane.b32.xlu1 %v445_v14, %s1844_s24  ;;  %460 = vrot.lane.b32.xlu0 %v425_v62, %s1844_s24  ;;  %v844_v14 = vrot.slane %v2465_v52, 2  ;;  %v845_v62 = vrot.slane %v2486_v48, 2 }
  0xde   : > { %v2481_v38 = vpop.permute.xlu1 %532  ;;  %v2483_v54 = vpop.permute.xlu0 %516  ;;  %v846_v11 = vsel %vm316_vm0, %v844_v14, %v845_v62  ;;  %v2556_v14 = vld [vmem:[%s1955_s14 + $0xa0] sm:$0xf] }
  0xe0   : > { %538 = vrot.lane.b32.xlu1 %v2305_v33, %s1845_s27  ;;  %522 = vrot.lane.b32.xlu0 %v2034_v34, %s1845_s27 }
  0xe2   : > { %v627_v29 = vpop.permute.xlu1 %626  ;;  %v611_v36 = vpop.permute.xlu0 %610 }
  0xe3   : > { %v2505_v33 = vsel %vm1041_vm5, %v1035_v42, %v627_v29  ;;  %v2508_v34 = vsel %vm1041_vm5, %v1027_v44, %v611_v36  ;;  %v1008_v44 = vsel %vm1007_vm3, %v991_v23, %v2327_v3  ;;  %v994_v42 = vsel %vm990_vm2, %v2043_v37, %v2420_v39 }
  0xe4   : > { %784 = vrot.lane.b32.xlu1 %v2486_v48, %s1848_s6  ;;  %768 = vrot.lane.b32.xlu0 %v2016_v28, %s1848_s6  ;;  %v1025_v10 = vsel %vm1024_vm4, %v1008_v44, %v2354_v50  ;;  %v932_v29 = vrot.slane %v2465_v52, 4  ;;  %v1011_v23 = vsel %vm1007_vm3, %v994_v42, %v2452_v27  ;;  %v1543_v52 = vld [vmem:[%s1955_s14 + $0xe8] sm:$0xf] }
  0xe5   : > { %v1042_v3 = vsel %vm1041_vm5, %v1025_v10, %v2372_v56  ;;  %v1028_v39 = vsel %vm1024_vm4, %v1011_v23, %v2483_v54  ;;  %v1000_v54 = vsel %vm990_vm2, %v1967_v6, %v2319_v60  ;;  %v604_v44 = vrot.slane %v1543_v52, 2  ;;  %v2999_v23 = vld [vmem:[#allocation8_spill] sm:$0xff] }
  0xe6   : > { %v2529_v55 = vpop.permute.xlu1 %872  ;;  %v2531_v61 = vpop.permute.xlu0 %856  ;;  %v1059_v50 = vsel %vm1058_vm6, %v1042_v3, %v2408_v53  ;;  %v2551_v53 = vld [vmem:[%s1955_s14 + $0x100] sm:$0xf]  ;;  %v934_v7 = vsel %vm405_vm1, %v932_v29, %v933_v51 }
  0xe7   : > { %v1076_v56 = vsel %vm1075_vm7, %v1059_v50, %v2446_v58  ;;  %v847_v5 = vrot.slane %v2551_v53, 2  ;;  %v2994_v50 = vld [vmem:[#allocation18_spill] sm:$0xff]  ;;  %v2998_v29 = vld [vmem:[#allocation5_spill] sm:$0xff] }
  0xe8   : > { %878 = vrot.lane.b32.xlu1 %v846_v11, %s1849_s8  ;;  %862 = vrot.lane.b32.xlu0 %v2055_v40, %s1849_s8  ;;  %v1093_v24 = vsel %vm1092_vm8, %v1076_v56, %v855_v43  ;;  %v827_v43 = vrot.slane %v2556_v14, 2  ;;  %v605_v59 = vsel %vm316_vm0, %v2994_v50, %v604_v44 }
  0xea   : > { %v959_v45 = vpop.permute.xlu1 %958  ;;  %v943_v13 = vpop.permute.xlu0 %942 }
  0xeb   : > { %v1118_v20 = vsel %vm1109_vm9, %v1101_v31, %v959_v45  ;;  %v1110_v40 = vsel %vm1109_vm9, %v1093_v24, %v943_v13  ;;  %v2995_v24 = vld [vmem:[#allocation7_spill] sm:$0xff] }
  0xec   : > { %540 = vrot.lane.b32.xlu1 %v2330_v4, %s1845_s27  ;;  %1640 = vmatprep.mubr.msk.f32.mxu1 %vm1131_vm10, %v1118_v20  ;;  %v1002_v4 = vsel %vm990_vm2, %v2037_v35, %v2418_v17  ;;  %v915_v20 = vrot.slane %v2556_v14, 4 }
  0xed   : > { %524 = vrot.lane.b32.xlu0 %v2037_v35, %s1845_s27  ;;  %1628 = vmatprep.mubr.msk.f32.mxu0 %vm1131_vm10, %v1110_v40  ;;  %v1019_v36 = vsel %vm1007_vm3, %v1002_v4, %v2450_v8  ;;  %v848_v35 = vsel %vm316_vm0, %v845_v62, %v847_v5  ;;  %v828_v8 = vsel %vm316_vm0, %v2028_v32, %v827_v43  ;;  %v2996_v40 = vld [vmem:[#allocation19_spill] sm:$0xff]  ;;  %v2997_v5 = vld [vmem:[#allocation10_spill] sm:$0xff]  ;;  %v692_v4 = vrot.slane %v1543_v52, 4 }
  0xee   : > { %v2565_v58 = vpop.permute.xlu1 %381  ;;  %v2567_v15 = vpop.permute.xlu0 %365  ;;  %v1036_v37 = vsel %vm1024_vm4, %v1019_v36, %v2481_v38  ;;  %v992_v38 = vsel %vm990_vm2, %v1958_v0, %v2307_v30  ;;  %v1017_v32 = vsel %vm1007_vm3, %v1000_v54, %v2340_v9  ;;  %v2991_v9 = vld [vmem:[#allocation20_spill] sm:$0xff] }
  0xef   : > { %v1009_v62 = vsel %vm1007_vm3, %v992_v38, %v2342_v12  ;;  %v1034_v0 = vsel %vm1024_vm4, %v1017_v32, %v2360_v18  ;;  %v2992_v12 = vld [vmem:[#allocation21_spill] sm:$0xff]  ;;  %v1003_v42 = vsel %vm990_vm2, %v2010_v26, %v2565_v58  ;;  %v693_v26 = vsel %vm405_vm1, %v2380_v25, %v692_v4  ;;  %v3000_v38 = vld [vmem:[#allocation11_spill] sm:$0xff] }
  0xf0   : > { %634 = vrot.lane.b32.xlu1 %v2350_v16, %s1846_s30  ;;  %v1026_v30 = vsel %vm1024_vm4, %v1009_v62, %v2362_v19  ;;  %v1051_v2 = vsel %vm1041_vm5, %v1034_v0, %v2991_v9  ;;  %v1569_v0 = vld [vmem:[%s1955_s14 + $0x118] sm:$0xf] }
  0xf1   : > { %618 = vrot.lane.b32.xlu0 %v2071_v46, %s1846_s30  ;;  %v1531_v46 = vld [vmem:[%s1955_s14 + $0x88] sm:$0xf]  ;;  %v1043_v10 = vsel %vm1041_vm5, %v1026_v30, %v2992_v12  ;;  %v1068_v1 = vsel %vm1058_vm6, %v1051_v2, %v2434_v21  ;;  %v1557_v9 = vld [vmem:[%s1955_s14 + $0xb8] sm:$0xf]  ;;  %v3002_v2 = vld [vmem:[#allocation13_spill] sm:$0xff] }
  0xf2   : > { %v629_v16 = vpop.permute.xlu1 %628  ;;  %v613_v17 = vpop.permute.xlu0 %612  ;;  %v584_v11 = vrot.slane %v1531_v46, 2  ;;  %v1060_v18 = vsel %vm1058_vm6, %v1043_v10, %v2436_v22  ;;  %v1085_v19 = vsel %vm1075_vm7, %v1068_v1, %v2467_v41  ;;  %v852_v10 = vrot.slane %v1569_v0, 2 }
  0xf3   : > { %v2595_v27 = vsel %vm1041_vm5, %v1036_v37, %v629_v16  ;;  %v2598_v48 = vsel %vm1041_vm5, %v1028_v39, %v613_v17  ;;  %v1077_v3 = vsel %vm1075_vm7, %v1060_v18, %v2469_v57  ;;  %v1102_v21 = vsel %vm1092_vm8, %v1085_v19, %v2529_v55  ;;  %v1567_v17 = vld [vmem:[%s1955_s14 + $0x108] sm:$0xff] }
  0xf4   : > { %880 = vrot.lane.b32.xlu1 %v848_v35, %s1849_s8  ;;  %v1094_v22 = vsel %vm1092_vm8, %v1077_v3, %v2531_v61  ;;  %v585_v41 = vsel %vm316_vm0, %v2995_v24, %v584_v11  ;;  %v935_v55 = vrot.slane %v2551_v53, 4  ;;  %v995_v53 = vsel %vm990_vm2, %v2998_v29, %v2567_v15 }
  0xf5   : > { %864 = vrot.lane.b32.xlu0 %v828_v8, %s1849_s8  ;;  %v916_v35 = vsel %vm405_vm1, %v2999_v23, %v915_v20  ;;  %v672_v37 = vrot.slane %v1531_v46, 4  ;;  %v1568_v46 = vld [vmem:[%s1955_s14 + $0x110] sm:$0xff]  ;;  %v849_v25 = vrot.slane %v1567_v17, 2  ;;  %v832_v18 = vrot.slane %v1557_v9, 2  ;;  %s202_s14 = sand.u32 1, %s1817_s16  }
  0xf6   : > { %v2618_v6 = vpop.permute.xlu1 %714  ;;  %v2620_v60 = vpop.permute.xlu0 %698  ;;  %v936_v43 = vsel %vm405_vm1, %v933_v51, %v935_v55  ;;  %v850_v54 = vrot.slane %v1568_v46, 2  ;;  %v938_v50 = vrot.slane %v1568_v46, 4  ;;  %v920_v55 = vrot.slane %v1557_v9, 4  ;;  %s2897_s27 = scalar_lea.sflag [#allocation3], %s202_s14 }
  0xf7   : > { %v673_v16 = vsel %vm405_vm1, %v2107_v63, %v672_v37  ;;  %v3001_v63 = vld [vmem:[#allocation6_spill] sm:$0xff]  ;;  %v1061_v37 = vsel %vm1058_vm6, %v2508_v34, %v2620_v60 }
  0xf8   : > { %966 = vrot.lane.b32.xlu1 %v934_v7, %s1850_s12  ;;  %v851_v12 = vsel %vm316_vm0, %v849_v25, %v850_v54 }
  0xf9   : > { %950 = vrot.lane.b32.xlu0 %v2993_v49, %s1850_s12  ;;  %v937_v49 = vrot.slane %v1567_v17, 4 }
  0xfa   : > { %v961_v56 = vpop.permute.xlu1 %960  ;;  %v945_v31 = vpop.permute.xlu0 %944 }
  0xfb   : > { %v1119_v45 = vsel %vm1109_vm9, %v1102_v21, %v961_v56  ;;  %v1111_v57 = vsel %vm1109_vm9, %v1094_v22, %v945_v31  ;;  %v853_v21 = vsel %vm316_vm0, %v850_v54, %v852_v10  ;;  %v833_v31 = vsel %vm316_vm0, %v2180_v47, %v832_v18  ;;  %v3005_v47 = vld [vmem:[#allocation16_spill] sm:$0xff] }
  0xfc   : > { %636 = vrot.lane.b32.xlu1 %v605_v59, %s1846_s30  ;;  %1641 = vmatmul.mubr.msk.f32.vlgmr.msra.gmra.mrb[0].mxu1 %vm1131_vm10, %v1119_v45  ;;  %v3003_v59 = vld [vmem:[#allocation15_spill] sm:$0xff]  ;;  %v939_v24 = vsel %vm405_vm1, %v937_v49, %v938_v50 }
  0xfd   : > { %620 = vrot.lane.b32.xlu0 %v585_v41, %s1846_s30  ;;  %1629 = vmatmul.mubr.msk.f32.vlgmr.msra.gmra.mrb[0].mxu0 %vm1131_vm10, %v1111_v57  ;;  %v940_v41 = vrot.slane %v1569_v0, 4 }
  0xfe   : > { %v384_v61 = vpop.permute.xlu1 %383  ;;  %v368_v13 = vpop.permute.xlu0 %367 }
  0xff   : > { %v1004_v32 = vsel %vm990_vm2, %v2016_v28, %v384_v61  ;;  %v996_v62 = vsel %vm990_vm2, %v3001_v63, %v368_v13  ;;  %v3004_v61 = vld [vmem:[#allocation17_spill] sm:$0xff]  ;;  %v941_v13 = vsel %vm405_vm1, %v938_v50, %v940_v41 }
 0x100   : > { %722 = vrot.lane.b32.xlu1 %v2996_v40, %s1847_s5 }
 0x101   : > { %706 = vrot.lane.b32.xlu0 %v2997_v5, %s1847_s5  ;;  %v921_v5 = vsel %vm405_vm1, %v3005_v47, %v920_v55 }
 0x102   : > { %v471_v36 = vpop.permute.xlu1 %470  ;;  %v455_v14 = vpop.permute.xlu0 %454 }
 0x103   : > { %v1020_v39 = vsel %vm1007_vm3, %v1003_v42, %v471_v36  ;;  %v1012_v51 = vsel %vm1007_vm3, %v995_v53, %v455_v14 }
 0x104   : > { %968 = vrot.lane.b32.xlu1 %v936_v43, %s1850_s12 }
 0x105   : > { %952 = vrot.lane.b32.xlu0 %v916_v35, %s1850_s12  ;;  %v1069_v35 = vsel %vm1058_vm6, %v2505_v33, %v2618_v6 }
 0x106   : > { %v2672_v58 = vpop.permute.xlu1 %716  ;;  %v2674_v15 = vpop.permute.xlu0 %700 }
 0x108   : > { %724 = vrot.lane.b32.xlu1 %v693_v26, %s1847_s5 }
 0x109   : > { %708 = vrot.lane.b32.xlu0 %v673_v16, %s1847_s5  ;;  %s1851_s5 = smov [#allocation2]  }
 0x10a   : > { %v779_v8 = vpop.permute.xlu1 %778  ;;  %v763_v52 = vpop.permute.xlu0 %762 }
 0x10c   : > { %786 = vrot.lane.b32.xlu1 %v1567_v17, %s1848_s6 }
 0x10d   : > { %770 = vrot.lane.b32.xlu0 %v3000_v38, %s1848_s6 }
 0x10e   : > { %v473_v7 = vpop.permute.xlu1 %472  ;;  %v457_v44 = vpop.permute.xlu0 %456 }
 0x10f   : > { %v1021_v30 = vsel %vm1007_vm3, %v1004_v32, %v473_v7  ;;  %v1013_v11 = vsel %vm1007_vm3, %v996_v62, %v457_v44  ;;  %v1070_v62 = vsel %vm1058_vm6, %v2595_v27, %v2672_v58  ;;  %v1062_v7 = vsel %vm1058_vm6, %v2598_v48, %v2674_v15  ;;  %v3006_v15 = vld [vmem:[#allocation12_spill] sm:$0xff] }
 0x110   : > { %788 = vrot.lane.b32.xlu1 %v1568_v46, %s1848_s6 }
 0x111   : > { %772 = vrot.lane.b32.xlu0 %v3002_v2, %s1848_s6  ;;  %s1514_s6 = sshll.u32 %s202_s14, 7 }
 0x112   : > { %v535_v28 = vpop.permute.xlu1 %534  ;;  %v519_v1 = vpop.permute.xlu0 %518 }
 0x113   : > { %v1037_v19 = vsel %vm1024_vm4, %v1020_v39, %v535_v28  ;;  %v1029_v3 = vsel %vm1024_vm4, %v1012_v51, %v519_v1  ;;  %v1086_v39 = vsel %vm1075_vm7, %v1069_v35, %v779_v8  ;;  %v1078_v51 = vsel %vm1075_vm7, %v1061_v37, %v763_v52 }
 0x114   : > { %882 = vrot.lane.b32.xlu1 %v851_v12, %s1849_s8 }
 0x115   : > { %866 = vrot.lane.b32.xlu0 %v3003_v59, %s1849_s8 }
 0x116   : > { %v781_v22 = vpop.permute.xlu1 %780  ;;  %v765_v56 = vpop.permute.xlu0 %764 }
 0x117   : > { %v1087_v44 = vsel %vm1075_vm7, %v1070_v62, %v781_v22  ;;  %v1079_v0 = vsel %vm1075_vm7, %v1062_v7, %v765_v56 }
 0x118   : > { %884 = vrot.lane.b32.xlu1 %v853_v21, %s1849_s8 }
 0x119   : > { %868 = vrot.lane.b32.xlu0 %v833_v31, %s1849_s8  ;;  %s2843_s8 = scalar_lea.vmem [#allocation2], %s1514_s6  ;;  %s1751_s6 = sshll.u32 %s1851_s5, 4  ;;  %s1752_s6 = int_to_ptr.vmem [resolvable:$false] %s1751_s6 }
 0x11a   : > { %v875_v45 = vpop.permute.xlu1 %874  ;;  %v859_v57 = vpop.permute.xlu0 %858  ;;  %s1423_s19 = sshll.u32 %s2843_s8, 4  ;;  %s2890_s19 = int_to_ptr.vmem [resolvable:$true] %s1423_s19 }
 0x11b   : > { %v1103_v26 = vsel %vm1092_vm8, %v1086_v39, %v875_v45  ;;  %v1095_v16 = vsel %vm1092_vm8, %v1078_v51, %v859_v57  ;;  %s1747_s30 = scalar_lea.vmem %s2890_s19, 2048  ;;  %p1754_p2 = scmp.lt.s32.totalorder %s2890_s19, %s1752_s6 }
 0x11c   : > { %970 = vrot.lane.b32.xlu1 %v939_v24, %s1850_s12  ;;  %p1748_p13 = scmp.ne.s32.totalorder %s2890_s19, %s1747_s30 }
 0x11d   : > { %954 = vrot.lane.b32.xlu0 %v3004_v61, %s1850_s12 }
 0x11e   : > { %v537_v20 = vpop.permute.xlu1 %536  ;;  %v521_v40 = vpop.permute.xlu0 %520  ;;  %p1749_p0 = pnand %p1748_p13, %p1929_p3 }
 0x11f   : > { %v1038_v43 = vsel %vm1024_vm4, %v1021_v30, %v537_v20  ;;  %v1030_v4 = vsel %vm1024_vm4, %v1013_v11, %v521_v40 }
 0x120   : > { %972 = vrot.lane.b32.xlu1 %v941_v13, %s1850_s12  ;;  %p1750_p1 = pneg %p1749_p0 }
 0x121   : > { %956 = vrot.lane.b32.xlu0 %v921_v5, %s1850_s12  ;;  %s1420_s12 = sadd.s32 %s1596_s10, %s1592_s11  ;;  %s1753_s10 = scalar_lea.vmem %s1752_s6, 4096 }
 0x122   : > { %v631_v42 = vpop.permute.xlu1 %630  ;;  %v615_v29 = vpop.permute.xlu0 %614  ;;  %s1593_s18 = sshll.u32 %s1420_s12, 7  ;;  %p1755_p4 = scmp.lt.s32.totalorder %s1753_s10, %s1747_s30 }
 0x123   : > { %v2719_v53 = vsel %vm1041_vm5, %v1037_v19, %v631_v42  ;;  %v2722_v36 = vsel %vm1041_vm5, %v1029_v3, %v615_v29  ;;  %s2887_s23 = scalar_lea.hbm %s2954_s4, %s1593_s18 }
 0x124   : > { %p1756_p5 = por %p1755_p4, %p1754_p2 }
 0x126   : > { %v877_v14 = vpop.permute.xlu1 %876  ;;  %v861_v23 = vpop.permute.xlu0 %860  ;;  %p1757_p6 = pnand %p1756_p5, %p1750_p1 }
 0x127   : > { %v1104_v30 = vsel %vm1092_vm8, %v1087_v44, %v877_v14  ;;  %v1096_v11 = vsel %vm1092_vm8, %v1079_v0, %v861_v23 }
 0x12a   : > { %v963_v17 = vpop.permute.xlu1 %962  ;;  %v947_v46 = vpop.permute.xlu0 %946 }
 0x12b   : > { %v1120_v25 = vsel %vm1109_vm9, %v1103_v26, %v963_v17  ;;  %v1112_v54 = vsel %vm1109_vm9, %v1095_v16, %v947_v46 }
 0x12c   : > { %1631 = vmatprep.mubr.msk.f32.mxu0 %vm1131_vm10, %v1112_v54  ;;  %1643 = vmatprep.mubr.msk.f32.mxu1 %vm1131_vm10, %v1120_v25 }
 0x12e   : > { %v386_v33 = vpop.permute.xlu1 %385  ;;  %v370_v34 = vpop.permute.xlu0 %369 }
 0x12f   : > { %v1005_v58 = vsel %vm990_vm2, %v3000_v38, %v386_v33  ;;  %v997_v1 = vsel %vm990_vm2, %v3006_v15, %v370_v34 }
 0x132   : > { %v633_v6 = vpop.permute.xlu1 %632  ;;  %v617_v60 = vpop.permute.xlu0 %616 }
 0x133   : > { %v1055_v8 = vsel %vm1041_vm5, %v1038_v43, %v633_v6  ;;  %v1047_v52 = vsel %vm1041_vm5, %v1030_v4, %v617_v60 }
 0x136   : > { %v719_v32 = vpop.permute.xlu1 %718  ;;  %v703_v63 = vpop.permute.xlu0 %702 }
 0x137   : > { %v1071_v43 = vsel %vm1058_vm6, %v2719_v53, %v719_v32  ;;  %v1063_v4 = vsel %vm1058_vm6, %v2722_v36, %v703_v63 }
 0x13a   : > { %v965_v9 = vpop.permute.xlu1 %964  ;;  %v949_v12 = vpop.permute.xlu0 %948 }
 0x13b   : > { %v1121_v10 = vsel %vm1109_vm9, %v1104_v30, %v965_v9  ;;  %v1113_v28 = vsel %vm1109_vm9, %v1096_v11, %v949_v12 }
 0x13c   : > { %1632 = vmatmul.mubr.msk.f32.gmra.mrb[2].mxu0 %vm1131_vm10, %v1113_v28  ;;  %1644 = vmatmul.mubr.msk.f32.gmra.mrb[2].mxu1 %vm1131_vm10, %v1121_v10 }
 0x13e   : > { %v2754_v27 = vpop.permute.xlu1 %387  ;;  %v2756_v48 = vpop.permute.xlu0 %371 }
 0x13f   : > { %v1006_v15 = vsel %vm990_vm2, %v3002_v2, %v2754_v27 }
 0x142   : > { %v475_v18 = vpop.permute.xlu1 %474  ;;  %v459_v19 = vpop.permute.xlu0 %458 }
 0x143   : > { %v1022_v3 = vsel %vm1007_vm3, %v1005_v58, %v475_v18  ;;  %v1014_v49 = vsel %vm1007_vm3, %v997_v1, %v459_v19  ;;  %v3007_v19 = vld [vmem:[#allocation14_spill] sm:$0xff] }
 0x146   : > { %v721_v50 = vpop.permute.xlu1 %720  ;;  %v705_v59 = vpop.permute.xlu0 %704 }
 0x147   : > { %v1072_v17 = vsel %vm1058_vm6, %v1055_v8, %v721_v50  ;;  %v1064_v46 = vsel %vm1058_vm6, %v1047_v52, %v705_v59  ;;  %v998_v50 = vsel %vm990_vm2, %v3007_v19, %v2756_v48 }
 0x14a   : > { %v783_v21 = vpop.permute.xlu1 %782  ;;  %v767_v22 = vpop.permute.xlu0 %766 }
 0x14b   : > { %v1088_v42 = vsel %vm1075_vm7, %v1071_v43, %v783_v21  ;;  %v1080_v29 = vsel %vm1075_vm7, %v1063_v4, %v767_v22 }
 0x14e   : > { %v477_v56 = vpop.permute.xlu1 %476  ;;  %v461_v31 = vpop.permute.xlu0 %460 }
 0x14f   : > { %v1015_v21 = vsel %vm1007_vm3, %v998_v50, %v461_v31 }
 0x152   : > { %v539_v24 = vpop.permute.xlu1 %538  ;;  %v523_v41 = vpop.permute.xlu0 %522 }
 0x153   : > { %v1039_v9 = vsel %vm1024_vm4, %v1022_v3, %v539_v24  ;;  %v1031_v10 = vsel %vm1024_vm4, %v1014_v49, %v523_v41  ;;  %v1023_v3 = vsel %vm1007_vm3, %v1006_v15, %v477_v56 }
 0x156   : > { %v785_v45 = vpop.permute.xlu1 %784  ;;  %v769_v57 = vpop.permute.xlu0 %768 }
 0x157   : > { %v1089_v25 = vsel %vm1075_vm7, %v1072_v17, %v785_v45  ;;  %v1081_v54 = vsel %vm1075_vm7, %v1064_v46, %v769_v57 }
 0x15a   : > { %v879_v38 = vpop.permute.xlu1 %878  ;;  %v863_v55 = vpop.permute.xlu0 %862 }
 0x15b   : > { %v1105_v14 = vsel %vm1092_vm8, %v1088_v42, %v879_v38  ;;  %v1097_v35 = vsel %vm1092_vm8, %v1080_v29, %v863_v55  ;;  %v2826_v29 = vld [vmem:[%s2952_s2] ss:$0 sm:$0xff] }
 0x15e   : > { %v541_v61 = vpop.permute.xlu1 %540 }
 0x15f   : > { %v525_v13 = vpop.permute.xlu0 %524  ;;  %v1040_v22 = vsel %vm1024_vm4, %v1023_v3, %v541_v61 }
 0x160   : > { %v1032_v41 = vsel %vm1024_vm4, %v1015_v21, %v525_v13 }
 0x162   : > { %v635_v20 = vpop.permute.xlu1 %634 }
 0x163   : > { %v619_v40 = vpop.permute.xlu0 %618  ;;  %v1056_v28 = vsel %vm1041_vm5, %v1039_v9, %v635_v20 }
 0x164   : > { %v1048_v1 = vsel %vm1041_vm5, %v1031_v10, %v619_v40 }
 0x166   : > { %v881_v47 = vpop.permute.xlu1 %880 }
 0x167   : > { %v865_v5 = vpop.permute.xlu0 %864  ;;  %v1106_v33 = vsel %vm1092_vm8, %v1089_v25, %v881_v47 }
 0x168   : > { %v1098_v6 = vsel %vm1092_vm8, %v1081_v54, %v865_v5 }
 0x16a   : > { %v967_v23 = vpop.permute.xlu1 %966 }
 0x16b   : > { %v1122_v37 = vsel %vm1109_vm9, %v1105_v14, %v967_v23  ;;  %v951_v39 = vpop.permute.xlu0 %950  ;;  %v2831_v14 = vld [vmem:[%s2953_s3] ss:$0 sm:$0xff] }
 0x16c   : > { %v1114_v51 = vsel %vm1109_vm9, %v1097_v35, %v951_v39  ;;  %1646 = vmatprep.mubr.msk.f32.mxu1 %vm1131_vm10, %v1122_v37 }
 0x16d   : > { %1634 = vmatprep.mubr.msk.f32.mxu0 %vm1131_vm10, %v1114_v51 }
 0x16e   : > { %v637_v53 = vpop.permute.xlu1 %636 }
 0x16f   : > { %v621_v36 = vpop.permute.xlu0 %620  ;;  %v1057_v45 = vsel %vm1041_vm5, %v1040_v22, %v637_v53 }
 0x170   : > { %v1049_v38 = vsel %vm1041_vm5, %v1032_v41, %v621_v36 }
 0x172   : > { %v723_v26 = vpop.permute.xlu1 %722 }
 0x173   : > { %v707_v16 = vpop.permute.xlu0 %706  ;;  %v1073_v18 = vsel %vm1058_vm6, %v1056_v28, %v723_v26 }
 0x174   : > { %v1065_v59 = vsel %vm1058_vm6, %v1048_v1, %v707_v16 }
 0x176   : > { %v969_v34 = vpop.permute.xlu1 %968 }
 0x177   : > { %v1123_v60 = vsel %vm1109_vm9, %v1106_v33, %v969_v34  ;;  %v953_v32 = vpop.permute.xlu0 %952 }
 0x178   : > { %v1115_v63 = vsel %vm1109_vm9, %v1098_v6, %v953_v32  ;;  %1647 = vmatmul.mubr.msk.f32.gmra.mrb[4].mxu1 %vm1131_vm10, %v1123_v60 }
 0x179   : > { %1635 = vmatmul.mubr.msk.f32.gmra.mrb[4].mxu0 %vm1131_vm10, %v1115_v63 }
 0x17a   : > { %v725_v8 = vpop.permute.xlu1 %724 }
 0x17b   : > { %v709_v52 = vpop.permute.xlu0 %708  ;;  %v1074_v31 = vsel %vm1058_vm6, %v1057_v45, %v725_v8 }
 0x17c   : > { %v1066_v61 = vsel %vm1058_vm6, %v1049_v38, %v709_v52 }
 0x17e   : > { %v787_v62 = vpop.permute.xlu1 %786 }
 0x17f   : > { %v771_v7 = vpop.permute.xlu0 %770  ;;  %v1090_v49 = vsel %vm1075_vm7, %v1073_v18, %v787_v62 }
 0x180   : > { %v1082_v2 = vsel %vm1075_vm7, %v1065_v59, %v771_v7 }
 0x182   : > { %v789_v44 = vpop.permute.xlu1 %788 }
 0x183   : > { %v773_v0 = vpop.permute.xlu0 %772  ;;  %v1091_v13 = vsel %vm1075_vm7, %v1074_v31, %v789_v44 }
 0x184   : > { %v1083_v20 = vsel %vm1075_vm7, %v1066_v61, %v773_v0 }
 0x186   : > { %v883_v30 = vpop.permute.xlu1 %882 }
 0x187   : > { %v867_v11 = vpop.permute.xlu0 %866  ;;  %v1107_v27 = vsel %vm1092_vm8, %v1090_v49, %v883_v30 }
 0x188   : > { %v1099_v48 = vsel %vm1092_vm8, %v1082_v2, %v867_v11 }
 0x18a   : > { %v885_v12 = vpop.permute.xlu1 %884 }
 0x18b   : > { %v869_v58 = vpop.permute.xlu0 %868  ;;  %v1108_v40 = vsel %vm1092_vm8, %v1091_v13, %v885_v12 }
 0x18c   : > { %v1100_v5 = vsel %vm1092_vm8, %v1083_v20, %v869_v58 }
 0x18e   : > { %v971_v24 = vpop.permute.xlu1 %970 }
 0x18f   : > { %v1124_v56 = vsel %vm1109_vm9, %v1107_v27, %v971_v24  ;;  %v955_v57 = vpop.permute.xlu0 %954 }
 0x190   : > { %v1116_v55 = vsel %vm1109_vm9, %v1099_v48, %v955_v57  ;;  %1649 = vmatprep.mubr.msk.f32.mxu1 %vm1131_vm10, %v1124_v56 }
 0x191   : > { %1637 = vmatprep.mubr.msk.f32.mxu0 %vm1131_vm10, %v1116_v55 }
 0x192   : > { %v973_v47 = vpop.permute.xlu1 %972 }
 0x193   : > { %v1125_v43 = vsel %vm1109_vm9, %v1108_v40, %v973_v47  ;;  %v957_v4 = vpop.permute.xlu0 %956 }
 0x194   : > { %v1117_v42 = vsel %vm1109_vm9, %v1100_v5, %v957_v4  ;;  %1650 = vmatmul.mubr.msk.f32.gmra.mrb[6].mxu1 %vm1131_vm10, %v1125_v43 }
 0x195   : > { %1638 = vmatmul.mubr.msk.f32.gmra.mrb[6].mxu0 %vm1131_vm10, %v1117_v42 }
 0x1cf   : > { %v1642_v23 = vpop.f32.mrb[0].mxu1 }
 0x1d0   : > { %v1630_v35 = vpop.f32.mrb[0].mxu0  ;;  %v1344_v37 = vmul.f32 %v1642_v23, %v2826_v29  ;;  %v1289_v39 = vpop.f32.mrb[1].mxu1 }
 0x1d1   : > { %v1336_v51 = vmul.f32 %v1630_v35, %v2826_v29  ;;  %v1249_v53 = vpop.f32.mrb[1].mxu0  ;;  %v1343_v36 = vmul.f32 %v2826_v29, %v1289_v39 }
 0x1d2   : > { %v1367_v26 = vadd.f32 %v2831_v14, %v1344_v37  ;;  %v1335_v16 = vmul.f32 %v2826_v29, %v1249_v53 }
 0x1d3   : > { %v1359_v17 = vadd.f32 %v2831_v14, %v1336_v51  ;;  %v1366_v46 = vadd.f32 %v2831_v14, %v1343_v36 }
 0x1d4   : > { %v1383_v25 = vmax.f32 %v1367_v26, 0.0  ;;  %v1358_v54 = vadd.f32 %v2831_v14, %v1335_v16 }
 0x1d5   : > { %v1375_v33 = vmax.f32 %v1359_v17, 0.0  ;;  %v1382_v34 = vmax.f32 %v1366_v46, 0.0 }
 0x1d6   : > { %1399 = vst [vmem:[%s2843_s8 + $0x48] sm:$0xff] %v1383_v25  ;;  %v1374_v6 = vmax.f32 %v1358_v54, 0.0 }
 0x1d7   : > { %1391 = vst [vmem:[%s2843_s8 + $0x8] sm:$0xff] %v1375_v33  ;;  %1398 = vst [vmem:[%s2843_s8 + $0x40] sm:$0xff] %v1382_v34 }
 0x1d8   : > { %1390 = vst [vmem:[%s2843_s8] sm:$0xff] %v1374_v6 }
 0x20f   : > { %v1633_v60 = vpop.f32.mrb[2].mxu0  ;;  %v1645_v32 = vpop.f32.mrb[2].mxu1 }
 0x210   : > { %v1338_v63 = vmul.f32 %v1633_v60, %v2826_v29  ;;  %v1346_v8 = vmul.f32 %v1645_v32, %v2826_v29  ;;  %v1259_v52 = vpop.f32.mrb[3].mxu0  ;;  %v1299_v62 = vpop.f32.mrb[3].mxu1 }
 0x211   : > { %v1337_v7 = vmul.f32 %v2826_v29, %v1259_v52  ;;  %v1345_v44 = vmul.f32 %v2826_v29, %v1299_v62 }
 0x212   : > { %v1361_v0 = vadd.f32 %v2831_v14, %v1338_v63  ;;  %v1369_v30 = vadd.f32 %v2831_v14, %v1346_v8 }
 0x213   : > { %v1360_v11 = vadd.f32 %v2831_v14, %v1337_v7  ;;  %v1368_v9 = vadd.f32 %v2831_v14, %v1345_v44 }
 0x214   : > { %v1377_v12 = vmax.f32 %v1361_v0, 0.0  ;;  %v1385_v10 = vmax.f32 %v1369_v30, 0.0 }
 0x215   : > { %v1376_v28 = vmax.f32 %v1360_v11, 0.0  ;;  %v1384_v58 = vmax.f32 %v1368_v9, 0.0 }
 0x216   : > { %1393 = vst [vmem:[%s2843_s8 + $0x18] sm:$0xff] %v1377_v12  ;;  %1401 = vst [vmem:[%s2843_s8 + $0x58] sm:$0xff] %v1385_v10 }
 0x217   : > { %1392 = vst [vmem:[%s2843_s8 + $0x10] sm:$0xff] %v1376_v28  ;;  %1400 = vst [vmem:[%s2843_s8 + $0x50] sm:$0xff] %v1384_v58 }
 0x24b   : > { %v1648_v15 = vpop.f32.mrb[4].mxu1 }
 0x24c   : > { %v1636_v1 = vpop.f32.mrb[4].mxu0  ;;  %v1348_v18 = vmul.f32 %v1648_v15, %v2826_v29  ;;  %v1309_v19 = vpop.f32.mrb[5].mxu1 }
 0x24d   : > { %v1340_v50 = vmul.f32 %v1636_v1, %v2826_v29  ;;  %v1269_v3 = vpop.f32.mrb[5].mxu0  ;;  %v1347_v59 = vmul.f32 %v2826_v29, %v1309_v19 }
 0x24e   : > { %v1371_v49 = vadd.f32 %v2831_v14, %v1348_v18  ;;  %v1339_v21 = vmul.f32 %v2826_v29, %v1269_v3 }
 0x24f   : > { %v1363_v22 = vadd.f32 %v2831_v14, %v1340_v50  ;;  %v1370_v2 = vadd.f32 %v2831_v14, %v1347_v59 }
 0x250   : > { %v1387_v27 = vmax.f32 %v1371_v49, 0.0  ;;  %v1362_v24 = vadd.f32 %v2831_v14, %v1339_v21 }
 0x251   : > { %v1379_v41 = vmax.f32 %v1363_v22, 0.0  ;;  %v1386_v45 = vmax.f32 %v1370_v2, 0.0 }
 0x252   : > { %1403 = vst [vmem:[%s2843_s8 + $0x68] sm:$0xff] %v1387_v27  ;;  %v1378_v48 = vmax.f32 %v1362_v24, 0.0 }
 0x253   : > { %1395 = vst [vmem:[%s2843_s8 + $0x28] sm:$0xff] %v1379_v41  ;;  %1402 = vst [vmem:[%s2843_s8 + $0x60] sm:$0xff] %v1386_v45 }
 0x254   : > { %1394 = vst [vmem:[%s2843_s8 + $0x20] sm:$0xff] %v1378_v48 }
 0x267   : > { %v1651_v56 = vpop.f32.mrb[6].mxu1 }
 0x268   : > { %v1639_v57 = vpop.f32.mrb[6].mxu0  ;;  %v1350_v38 = vmul.f32 %v1651_v56, %v2826_v29  ;;  %v1319_v31 = vpop.f32.mrb[7].mxu1 }
 0x269   : > { %v1342_v55 = vmul.f32 %v1639_v57, %v2826_v29  ;;  %v1279_v61 = vpop.f32.mrb[7].mxu0  ;;  %v1349_v13 = vmul.f32 %v2826_v29, %v1319_v31 }
 0x26a   : > { %v1373_v20 = vadd.f32 %v2831_v14, %v1350_v38  ;;  %v1341_v40 = vmul.f32 %v2826_v29, %v1279_v61 }
 0x26b   : > { %v1365_v47 = vadd.f32 %v2831_v14, %v1342_v55  ;;  %v1372_v5 = vadd.f32 %v2831_v14, %v1349_v13 }
 0x26c   : > { %v1389_v43 = vmax.f32 %v1373_v20, 0.0  ;;  %v1364_v4 = vadd.f32 %v2831_v14, %v1341_v40 }
 0x26d   : > { %v1381_v42 = vmax.f32 %v1365_v47, 0.0  ;;  %v1388_v23 = vmax.f32 %v1372_v5, 0.0 }
 0x26e   : > { %1405 = vst [vmem:[%s2843_s8 + $0x78] sm:$0xff] %v1389_v43  ;;  %v1380_v29 = vmax.f32 %v1364_v4, 0.0 }
 0x26f   : > { %1397 = vst [vmem:[%s2843_s8 + $0x38] sm:$0xff] %v1381_v42  ;;  %1404 = vst [vmem:[%s2843_s8 + $0x70] sm:$0xff] %v1388_v23 }
 0x270   : > { %1396 = vst [vmem:[%s2843_s8 + $0x30] sm:$0xff] %v1380_v29 }
 0x271   : > { %1760 = shalt.err (!%p1757_p6)
}
 0x272   : > { %s1761_s14 = scalar_lea.hbm %s2887_s23, 2048  ;;  %s1765_s12 = scalar_lea.hbm %s2954_s4, 8192 }
 0x273   : > { %p1762_p7 = scmp.ne.s32.totalorder %s2887_s23, %s1761_s14  ;;  %p1766_p11 = scmp.lt.u32.totalorder %s2887_s23, %s2954_s4 }
 0x274   : > { %p1767_p12 = scmp.lt.u32.totalorder %s1765_s12, %s1761_s14  ;;  %p1769_p0 = scmp.lt.u32.totalorder %s1761_s14, %s2887_s23 }
 0x275   : > { %p1763_p9 = pnand %p1762_p7, %p1929_p3 }
 0x276   : > { %p1768_p13 = por %p1767_p12, %p1766_p11 }
 0x277   : > { %p1764_p10 = pneg %p1763_p9 }
 0x278   : > { %p1770_p1 = por %p1769_p0, %p1768_p13 }
 0x27a   : > { %p1771_p2 = pnand %p1770_p1, %p1764_p10 }
 0x27c   : > { %1774 = shalt.err (!%p1771_p2)
}
 0x27d   : > { %s1852_s9 = smov 128  }
 0x27e   : > { %1667 = dma.vmem_to_hbm [thread:$0]  (%p1929_p3), %s2890_s19, 2048, %s2887_s23, %s2897_s27, %s1852_s9, %s1852_s9, %s1844_s24  }
 0x27f PF: > { %p1673_p4 = scmp.ge.s32.totalorder %s1841_s22, 2  ;;  %s1438_s30 = sand.u32 1, %s1813_s15  }
 0x280   : > { %s1439_s5 = scalar_lea.sflag [#allocation3], %s1438_s30 }
 0x281   : > { %p1670_p5 = pnand %p1673_p4, %p1938_p8 }
 0x283   : > { %1808 = dma.done.wait (!%p1670_p5), %s1439_s5, 2048  }
 0x284   : > { %1810 = vsyncadd (!%p1670_p5), %s1439_s5, 4294965248  ;;  %s17_s22 = sadd.s32 1, %s1841_s22   ;;  %s3008_s15 = smov %s1817_s16 }
 0x285   : > { %p14_p6 = scmp.ge.s32.totalorder %s17_s22, 6   ;;  %s3009_s16 = smov %s1821_s17 }
 0x286   : > { %s3010_s17 = smov %s1947_s7  ;;  %s3011_s18 = smov %s1833_s20 }
 0x287   : > { %s3012_s19 = smov %s1837_s21  ;;  %s3013_s20 = smov %s3016_s25 }
 0x288   : > { %s3014_s21 = smov %s3020_s26  ;;  %16 = sbr.rel (!%p14_p6) target bundleno = 5 (0x5), region = 74 }
 0x28f   :  { %1444 = vsyncpa [#allocation3], 1 }
 0x290   :  { %1446 = vsyncpa [#allocation3 + $0x1], 1 }

</bundles_post_ra>
